<compile_context>
chip_gen: v7x
topology: tpu7x:2x2x1
jax: 0.10.0
libtpu: 0.0.40
codegen_flags: <defaults>
</compile_context>

<pallas_src>
import jax
import jax.numpy as jnp
from jax.experimental import pallas as pl
from jax.experimental.pallas import tpu as pltpu


def _round_up(x, m):
    return (x + m - 1) // m * m


def mnist_kernel(x_ref, w1_ref, b1_ref, w2_ref, b2_ref, w3_ref, b3_ref, o_ref):
    # ---- hot path: 3 MXU matmuls (bf16 in, f32 acc) + ReLU + stable log_softmax ----
    x = x_ref[...]                                                      # (TILE_B, 896) bf16

    h1 = jnp.dot(x, w1_ref[...], preferred_element_type=jnp.float32) + b1_ref[...]
    h1 = jnp.maximum(h1, 0.0)                                           # ReLU (f32)
    # Dropout(0.1): identity in eval mode.

    h2 = jnp.dot(h1.astype(w2_ref.dtype), w2_ref[...],
                 preferred_element_type=jnp.float32) + b2_ref[...]
    h2 = jnp.maximum(h2, 0.0)                                           # ReLU (f32)
    # Dropout(0.1): identity in eval mode.

    logits = jnp.dot(h2.astype(w3_ref.dtype), w3_ref[...],
                     preferred_element_type=jnp.float32) + b3_ref[...]  # (TILE_B, 128)
    # Padded class columns carry bias -1e30 -> exp underflows to 0, so they do
    # not perturb the log_softmax over the 10 real classes.

    m = jnp.max(logits, axis=-1, keepdims=True)
    shifted = logits - m
    lse = jnp.log(jnp.sum(jnp.exp(shifted), axis=-1, keepdims=True))
    o_ref[...] = (shifted - lse).astype(o_ref.dtype)


def mnist_forward(x_nchw, params, *, tile_b=None):
    """x_nchw: (B, 1, 28, 28) float32. Returns (B, 10) log-probabilities (f32)."""
    w1, b1, w2, b2, w3, b3 = params
    B = x_nchw.shape[0]
    D = w1.shape[0]            # 784
    H = w1.shape[1]            # hidden_size
    C = w3.shape[1]            # 10 classes

    LANE, SUB = 128, 8
    D_pad = _round_up(D, LANE)        # 896 = 7 * 128
    C_pad = LANE                      # lane-dense output block

    # Batch tiling: small batches -> single aligned tile; large batches ->
    # many tiles of <= 1024 rows (double-buffered x stays well under VMEM on
    # all of v5e / v6e / v7x, and the grid feeds both v7x TensorCores).
    if tile_b is None:
        tile_b = min(1024, _round_up(B, SUB))
    B_pad = _round_up(B, tile_b)
    grid_b = B_pad // tile_b

    # nn.Flatten() + pad batch/features; bf16 halves HBM traffic and feeds the MXU natively.
    x2d = x_nchw.reshape(B, D)
    x2d = jnp.pad(x2d, ((0, B_pad - B), (0, D_pad - D))).astype(jnp.bfloat16)

    # NOTE: in production these padded/bf16 weights would be prepared once, not per call.
    w1p = jnp.pad(w1, ((0, D_pad - D), (0, 0))).astype(jnp.bfloat16)    # zero rows for padded features
    w2p = w2.astype(jnp.bfloat16)
    w3p = jnp.pad(w3, ((0, 0), (0, C_pad - C))).astype(jnp.bfloat16)    # zero cols for padded classes
    b1p = b1.astype(jnp.float32)
    b2p = b2.astype(jnp.float32)
    b3p = jnp.pad(b3.astype(jnp.float32), ((0, 0), (0, C_pad - C)),
                  constant_values=-1e30)                                 # kill padded-class logits

    out = pl.pallas_call(
        mnist_kernel,
        out_shape=jax.ShapeDtypeStruct((B_pad, C_pad), jnp.float32),
        grid=(grid_b,),
        in_specs=[
            pl.BlockSpec((tile_b, D_pad), lambda i: (i, 0)),   # x: streamed per batch tile
            pl.BlockSpec((D_pad, H),      lambda i: (0, 0)),   # W1: VMEM-resident
            pl.BlockSpec((1, H),          lambda i: (0, 0)),   # b1
            pl.BlockSpec((H, H),          lambda i: (0, 0)),   # W2
            pl.BlockSpec((1, H),          lambda i: (0, 0)),   # b2
            pl.BlockSpec((H, C_pad),      lambda i: (0, 0)),   # W3
            pl.BlockSpec((1, C_pad),      lambda i: (0, 0)),   # b3
        ],
        out_specs=pl.BlockSpec((tile_b, C_pad), lambda i: (i, 0)),
        compiler_params=pltpu.CompilerParams(
            dimension_semantics=("parallel",),        # shards batch tiles across TCs (v7x megacore)
            vmem_limit_bytes=48 * 1024 * 1024,        # headroom for big tiles; < 64 MiB v7x physical
        ),
    )(x2d, w1p, b1p, w2p, b2p, w3p, b3p)

    return out[:B, :C]


def init_params(key, in_features, hidden_size, num_classes):
    """Deterministic init matching PyTorch nn.Linear default:
    U(-1/sqrt(fan_in), 1/sqrt(fan_in)); weights stored as (in, out)."""
    def linear(k, fan_in, fan_out):
        kw, kb = jax.random.split(k)
        bound = 1.0 / jnp.sqrt(jnp.float32(fan_in))
        w = jax.random.uniform(kw, (fan_in, fan_out), jnp.float32, -bound, bound)
        b = jax.random.uniform(kb, (1, fan_out), jnp.float32, -bound, bound)
        return w, b

    k1, k2, k3 = jax.random.split(key, 3)
    w1, b1 = linear(k1, in_features, hidden_size)
    w2, b2 = linear(k2, hidden_size, hidden_size)
    w3, b3 = linear(k3, hidden_size, num_classes)
    return (w1, b1, w2, b2, w3, b3)


def _reference_forward(x_nchw, params):
    """Pure-JAX f32 reference (eval-mode dropout = identity)."""
    w1, b1, w2, b2, w3, b3 = params
    x = x_nchw.reshape(x_nchw.shape[0], -1)
    h1 = jnp.maximum(x @ w1 + b1, 0.0)
    h2 = jnp.maximum(h1 @ w2 + b2, 0.0)
    logits = h2 @ w3 + b3
    return jax.nn.log_softmax(logits, axis=-1)


if __name__ == "__main__":
    key = jax.random.PRNGKey(0)
    k_x, k_p = jax.random.split(key)

    B, C_in, Hsp, Wsp = 8, 1, 28, 28          # MNIST dims fixed by the module
    hidden_size = 32
    num_classes = 10

    x = jax.random.normal(k_x, (B, C_in, Hsp, Wsp), jnp.float32)
    params = init_params(k_p, C_in * Hsp * Wsp, hidden_size, num_classes)

    out = mnist_forward(x, params)
    out = jax.block_until_ready(out)

    assert out.shape == (B, num_classes)

    # Sanity: log-probabilities should (approximately) sum to 1 after exp.
    sums = jnp.exp(out).sum(axis=1)
    assert jnp.allclose(sums, jnp.ones_like(sums), atol=1e-3)

    # Numerical check vs. pure-JAX f32 reference (loose tolerance: bf16 matmuls).
    ref = _reference_forward(x, params)
    assert jnp.allclose(out, ref, atol=1e-1, rtol=1e-2)

    print("KERNEL_OK")
</pallas_src>

<mosaic_0001>
module attributes {stable_mosaic.version = 11 : i64} {
  func.func @mnist_kernel(%arg0: i32, %arg1: memref<8x896xbf16, #tpu.memory_space<vmem>>, %arg2: memref<896x32xbf16, #tpu.memory_space<vmem>>, %arg3: memref<1x32xf32, #tpu.memory_space<vmem>>, %arg4: memref<32x32xbf16, #tpu.memory_space<vmem>>, %arg5: memref<1x32xf32, #tpu.memory_space<vmem>>, %arg6: memref<32x128xbf16, #tpu.memory_space<vmem>>, %arg7: memref<1x128xf32, #tpu.memory_space<vmem>>, %arg8: memref<8x128xf32, #tpu.memory_space<vmem>>) attributes {dimension_semantics = [#tpu.dimension_semantics<parallel>], iteration_bounds = array<i64: 1>, scalar_prefetch = 0 : i64, scratch_operands = 0 : i64, tpu.core_type = #tpu.core_type<tc>, window_params = [{transform_indices = @transform_0, window_bounds = array<i64: 8, 896>}, {pipeline_mode = #tpu.pipeline_mode<synchronous>, transform_indices = @transform_1, window_bounds = array<i64: 896, 32>}, {pipeline_mode = #tpu.pipeline_mode<synchronous>, transform_indices = @transform_2, window_bounds = array<i64: 1, 32>}, {pipeline_mode = #tpu.pipeline_mode<synchronous>, transform_indices = @transform_3, window_bounds = array<i64: 32, 32>}, {pipeline_mode = #tpu.pipeline_mode<synchronous>, transform_indices = @transform_4, window_bounds = array<i64: 1, 32>}, {pipeline_mode = #tpu.pipeline_mode<synchronous>, transform_indices = @transform_5, window_bounds = array<i64: 32, 128>}, {pipeline_mode = #tpu.pipeline_mode<synchronous>, transform_indices = @transform_6, window_bounds = array<i64: 1, 128>}, {transform_indices = @transform_7, window_bounds = array<i64: 8, 128>}]} {
    %c0 = arith.constant 0 : index
    %c0_0 = arith.constant 0 : index
    %0 = vector.load %arg1[%c0, %c0_0] : memref<8x896xbf16, #tpu.memory_space<vmem>>, vector<8x896xbf16>
    %c0_1 = arith.constant 0 : index
    %c0_2 = arith.constant 0 : index
    %1 = vector.load %arg2[%c0_1, %c0_2] : memref<896x32xbf16, #tpu.memory_space<vmem>>, vector<896x32xbf16>
    %cst = arith.constant dense<0.000000e+00> : vector<8x32xf32>
    %2 = tpu.matmul %0, %1, %cst {dimension_numbers = #tpu.dot_dimension_numbers<[1], [0], [0], [1], [0, 0, 1, 1], [], []>} : vector<8x896xbf16>, vector<896x32xbf16>, vector<8x32xf32> -> vector<8x32xf32>
    %c0_3 = arith.constant 0 : index
    %c0_4 = arith.constant 0 : index
    %3 = vector.load %arg3[%c0_3, %c0_4] : memref<1x32xf32, #tpu.memory_space<vmem>>, vector<1x32xf32>
    %4 = vector.broadcast %3 : vector<1x32xf32> to vector<8x32xf32>
    %5 = arith.addf %2, %4 : vector<8x32xf32>
    %cst_5 = arith.constant 0.000000e+00 : f32
    %6 = vector.broadcast %cst_5 : f32 to vector<8x32xf32>
    %7 = arith.maximumf %5, %6 : vector<8x32xf32>
    %8 = arith.truncf %7 : vector<8x32xf32> to vector<8x32xbf16>
    %c0_6 = arith.constant 0 : index
    %c0_7 = arith.constant 0 : index
    %9 = vector.load %arg4[%c0_6, %c0_7] : memref<32x32xbf16, #tpu.memory_space<vmem>>, vector<32x32xbf16>
    %cst_8 = arith.constant dense<0.000000e+00> : vector<8x32xf32>
    %10 = tpu.matmul %8, %9, %cst_8 {dimension_numbers = #tpu.dot_dimension_numbers<[1], [0], [0], [1], [0, 0, 1, 1], [], []>} : vector<8x32xbf16>, vector<32x32xbf16>, vector<8x32xf32> -> vector<8x32xf32>
    %c0_9 = arith.constant 0 : index
    %c0_10 = arith.constant 0 : index
    %11 = vector.load %arg5[%c0_9, %c0_10] : memref<1x32xf32, #tpu.memory_space<vmem>>, vector<1x32xf32>
    %12 = vector.broadcast %11 : vector<1x32xf32> to vector<8x32xf32>
    %13 = arith.addf %10, %12 : vector<8x32xf32>
    %cst_11 = arith.constant 0.000000e+00 : f32
    %14 = vector.broadcast %cst_11 : f32 to vector<8x32xf32>
    %15 = arith.maximumf %13, %14 : vector<8x32xf32>
    %16 = arith.truncf %15 : vector<8x32xf32> to vector<8x32xbf16>
    %c0_12 = arith.constant 0 : index
    %c0_13 = arith.constant 0 : index
    %17 = vector.load %arg6[%c0_12, %c0_13] : memref<32x128xbf16, #tpu.memory_space<vmem>>, vector<32x128xbf16>
    %cst_14 = arith.constant dense<0.000000e+00> : vector<8x128xf32>
    %18 = tpu.matmul %16, %17, %cst_14 {dimension_numbers = #tpu.dot_dimension_numbers<[1], [0], [0], [1], [0, 0, 1, 1], [], []>} : vector<8x32xbf16>, vector<32x128xbf16>, vector<8x128xf32> -> vector<8x128xf32>
    %c0_15 = arith.constant 0 : index
    %c0_16 = arith.constant 0 : index
    %19 = vector.load %arg7[%c0_15, %c0_16] : memref<1x128xf32, #tpu.memory_space<vmem>>, vector<1x128xf32>
    %20 = vector.broadcast %19 : vector<1x128xf32> to vector<8x128xf32>
    %21 = arith.addf %18, %20 : vector<8x128xf32>
    %cst_17 = arith.constant dense<0xFF800000> : vector<8xf32>
    %22 = vector.multi_reduction <maximumf>, %21, %cst_17 [1] : vector<8x128xf32> to vector<8xf32>
    %23 = vector.shape_cast %22 : vector<8xf32> to vector<8x1xf32>
    %24 = vector.broadcast %23 : vector<8x1xf32> to vector<8x128xf32>
    %25 = arith.subf %21, %24 : vector<8x128xf32>
    %26 = math.exp %25 : vector<8x128xf32>
    %cst_18 = arith.constant dense<0.000000e+00> : vector<8xf32>
    %27 = vector.multi_reduction <add>, %26, %cst_18 [1] : vector<8x128xf32> to vector<8xf32>
    %28 = vector.shape_cast %27 : vector<8xf32> to vector<8x1xf32>
    %29 = math.log %28 : vector<8x1xf32>
    %30 = vector.broadcast %29 : vector<8x1xf32> to vector<8x128xf32>
    %31 = arith.subf %25, %30 : vector<8x128xf32>
    %c0_19 = arith.constant 0 : index
    %c0_20 = arith.constant 0 : index
    %32 = vector.load %arg8[%c0_19, %c0_20] : memref<8x128xf32, #tpu.memory_space<vmem>>, vector<8x128xf32>
    tpu.vector_store %arg8[%c0_19, %c0_20], %31 {strides = array<i32>} : memref<8x128xf32, #tpu.memory_space<vmem>>, vector<8x128xf32>,
    return
  }
  func.func @transform_0(%arg0: i32) -> (i32, i32) {
    %c0_i32 = arith.constant 0 : i32
    %c0_i32_0 = arith.constant 0 : i32
    return %arg0, %c0_i32 : i32, i32
  }
  func.func @transform_1(%arg0: i32) -> (i32, i32) {
    %c0_i32 = arith.constant 0 : i32
    %c0_i32_0 = arith.constant 0 : i32
    %c0_i32_1 = arith.constant 0 : i32
    return %c0_i32, %c0_i32_0 : i32, i32
  }
  func.func @transform_2(%arg0: i32) -> (i32, i32) {
    %c0_i32 = arith.constant 0 : i32
    %c0_i32_0 = arith.constant 0 : i32
    %c0_i32_1 = arith.constant 0 : i32
    return %c0_i32, %c0_i32_0 : i32, i32
  }
  func.func @transform_3(%arg0: i32) -> (i32, i32) {
    %c0_i32 = arith.constant 0 : i32
    %c0_i32_0 = arith.constant 0 : i32
    %c0_i32_1 = arith.constant 0 : i32
    return %c0_i32, %c0_i32_0 : i32, i32
  }
  func.func @transform_4(%arg0: i32) -> (i32, i32) {
    %c0_i32 = arith.constant 0 : i32
    %c0_i32_0 = arith.constant 0 : i32
    %c0_i32_1 = arith.constant 0 : i32
    return %c0_i32, %c0_i32_0 : i32, i32
  }
  func.func @transform_5(%arg0: i32) -> (i32, i32) {
    %c0_i32 = arith.constant 0 : i32
    %c0_i32_0 = arith.constant 0 : i32
    %c0_i32_1 = arith.constant 0 : i32
    return %c0_i32, %c0_i32_0 : i32, i32
  }
  func.func @transform_6(%arg0: i32) -> (i32, i32) {
    %c0_i32 = arith.constant 0 : i32
    %c0_i32_0 = arith.constant 0 : i32
    %c0_i32_1 = arith.constant 0 : i32
    return %c0_i32, %c0_i32_0 : i32, i32
  }
  func.func @transform_7(%arg0: i32) -> (i32, i32) {
    %c0_i32 = arith.constant 0 : i32
    %c0_i32_0 = arith.constant 0 : i32
    return %arg0, %c0_i32 : i32, i32
  }
}

</mosaic_0001>

<bundles_post_ra>
// kernel: tpu_custom_call.1
= control target key start
LH: loop header
LB: loop body
LE: loop exit
PB: predicated region body
PF: predicated region fallthrough
CT: control target
= control target key end

     0   :  { %v1121_v42 = vmov 0.0   ;;  %vm1122_vm0 = vmmov 0   ;;  %s1395_s0 = inlined_call_operand.vmem [shape: bf16[8,896], index: 0, kind: input, shape index: {}]   ;;  %s1396_s1 = inlined_call_operand.vmem [shape: bf16[896,32], index: 1, kind: input, shape index: {}]   ;;  %s1397_s2 = inlined_call_operand.vmem [shape: f32[1,32], index: 2, kind: input, shape index: {}]   ;;  %s1398_s3 = inlined_call_operand.vmem [shape: bf16[32,32], index: 3, kind: input, shape index: {}]   ;;  %s1399_s4 = inlined_call_operand.vmem [shape: f32[1,32], index: 4, kind: input, shape index: {}]   ;;  %s1400_s5 = inlined_call_operand.vmem [shape: bf16[32,128], index: 5, kind: input, shape index: {}]   ;;  %s1401_s6 = inlined_call_operand.vmem [shape: f32[1,128], index: 6, kind: input, shape index: {}]   ;;  %s1402_s7 = inlined_call_operand.hbm [shape: f32[8,128], index: 7, kind: output, shape index: {}]  }
   0x1   :  { %v1026_v0 = vld [vmem:[%s1396_s1 + $0x40] sm:$0xff]   ;;  %v1030_v4 = vld [vmem:[%s1396_s1 + $0x48] sm:$0xff]   ;;  %v1034_v8 = vld [vmem:[%s1396_s1 + $0x50] sm:$0xff]  }
   0x2   :  { %v1027_v1 = vld [vmem:[%s1396_s1] sm:$0xff]   ;;  %906 = vmatprep.subr.bf16.mxu0 %v1026_v0  ;;  %v1031_v5 = vld [vmem:[%s1396_s1 + $0x8] sm:$0xff]   ;;  %v1035_v9 = vld [vmem:[%s1396_s1 + $0x10] sm:$0xff]  }
   0x3   :  { %v1028_v2 = vld [vmem:[%s1396_s1 + $0xc0] sm:$0xff]   ;;  %907 = vmatpush3.bf16.msra.mxu0 %v1027_v1  ;;  %v1032_v6 = vld [vmem:[%s1396_s1 + $0xc8] sm:$0xff]   ;;  %v1036_v10 = vld [vmem:[%s1396_s1 + $0xd0] sm:$0xff]  }
   0x4   :  { %v1029_v3 = vld [vmem:[%s1396_s1 + $0x80] sm:$0xff]   ;;  %928 = vmatprep.subr.bf16.mxu1 %v1028_v2  ;;  %908 = vmatprep.subr.bf16.mxu0 %v1030_v4  ;;  %v1033_v7 = vld [vmem:[%s1396_s1 + $0x88] sm:$0xff]   ;;  %v1037_v11 = vld [vmem:[%s1396_s1 + $0x90] sm:$0xff]  }
   0x5   :  { %929 = vmatpush3.bf16.msra.mxu1 %v1029_v3  ;;  %v1038_v12 = vld [vmem:[%s1396_s1 + $0x58] sm:$0xff]   ;;  %v1042_v16 = vld [vmem:[%s1396_s1 + $0x60] sm:$0xff]   ;;  %v1046_v20 = vld [vmem:[%s1396_s1 + $0x68] sm:$0xff]  }
   0x6   :  { %930 = vmatprep.subr.bf16.mxu1 %v1032_v6  ;;  %v1039_v13 = vld [vmem:[%s1396_s1 + $0x18] sm:$0xff]   ;;  %v1043_v17 = vld [vmem:[%s1396_s1 + $0x20] sm:$0xff]   ;;  %v1047_v21 = vld [vmem:[%s1396_s1 + $0x28] sm:$0xff]  }
   0x7   :  { %909 = vmatpush3.bf16.msra.mxu0 %v1031_v5  ;;  %v1040_v14 = vld [vmem:[%s1396_s1 + $0xd8] sm:$0xff]   ;;  %v1044_v18 = vld [vmem:[%s1396_s1 + $0xe0] sm:$0xff]   ;;  %v1048_v22 = vld [vmem:[%s1396_s1 + $0xe8] sm:$0xff]  }
   0x8   :  { %910 = vmatprep.subr.bf16.mxu0 %v1034_v8  ;;  %v1041_v15 = vld [vmem:[%s1396_s1 + $0x98] sm:$0xff]   ;;  %v1045_v19 = vld [vmem:[%s1396_s1 + $0xa0] sm:$0xff]   ;;  %v1049_v23 = vld [vmem:[%s1396_s1 + $0xa8] sm:$0xff]  }
   0x9   :  { %931 = vmatpush3.bf16.msra.mxu1 %v1033_v7  ;;  %v1050_v24 = vld [vmem:[%s1396_s1 + $0x70] sm:$0xff]   ;;  %v1054_v28 = vld [vmem:[%s1396_s1 + $0x78] sm:$0xff]   ;;  %v28_v31 = vld [vmem:[%s1395_s0] sm:$0xff] }
   0xa   :  { %932 = vmatprep.subr.bf16.mxu1 %v1036_v10  ;;  %v1051_v25 = vld [vmem:[%s1396_s1 + $0x30] sm:$0xff]   ;;  %v1055_v29 = vld [vmem:[%s1396_s1 + $0x38] sm:$0xff]   ;;  %v835_v32 = vcombine.low %v28_v31, %v28_v31  ;;  %v836_v33 = vcombine.high %v28_v31, %v28_v31  ;;  %v1060_v35 = vld [vmem:[%s1396_s1 + $0x140] sm:$0xff]  }
   0xb   :  { %911 = vmatpush3.bf16.msra.mxu0 %v1035_v9  ;;  %v1052_v26 = vld [vmem:[%s1396_s1 + $0xf0] sm:$0xff]   ;;  %v1056_v30 = vld [vmem:[%s1396_s1 + $0xf8] sm:$0xff]   ;;  %v29_v36 = vld [vmem:[%s1395_s0 + $0x8] sm:$0xff] }
   0xc   :  { %912 = vmatprep.subr.bf16.mxu0 %v1038_v12  ;;  %v1053_v27 = vld [vmem:[%s1396_s1 + $0xb0] sm:$0xff]   ;;  %v1059_v34 = vld [vmem:[%s1396_s1 + $0xb8] sm:$0xff]   ;;  %544 = vmatprep.mubr.bf16.mxu0 %v836_v33  ;;  %v837_v37 = vcombine.low %v29_v36, %v29_v36  ;;  %v838_v38 = vcombine.high %v29_v36, %v29_v36  ;;  %v1063_v39 = vld [vmem:[%s1396_s1 + $0x100] sm:$0xff]  }
   0xd   :  { %933 = vmatpush3.bf16.msra.mxu1 %v1037_v11  ;;  %v1064_v40 = vld [vmem:[%s1396_s1 + $0x180] sm:$0xff]   ;;  %v1065_v41 = vld [vmem:[%s1396_s1 + $0x148] sm:$0xff]   ;;  %v1068_v45 = vld [vmem:[%s1396_s1 + $0x150] sm:$0xff]  }
   0xe   :  { %934 = vmatprep.subr.bf16.mxu1 %v1040_v14  ;;  %584 = vmatprep.mubr.bf16.mxu1 %v838_v38  ;;  %v1066_v43 = vld [vmem:[%s1396_s1 + $0x108] sm:$0xff]   ;;  %v1069_v46 = vld [vmem:[%s1396_s1 + $0x110] sm:$0xff]   ;;  %v1071_v48 = vld [vmem:[%s1396_s1 + $0x158] sm:$0xff]  }
   0xf   :  { %913 = vmatpush3.bf16.msra.mxu0 %v1039_v13  ;;  %v1067_v44 = vld [vmem:[%s1396_s1 + $0x188] sm:$0xff]   ;;  %v1070_v47 = vld [vmem:[%s1396_s1 + $0x190] sm:$0xff]   ;;  %v1072_v49 = vld [vmem:[%s1396_s1 + $0x118] sm:$0xff]  }
  0x10   :  { %914 = vmatprep.subr.bf16.mxu0 %v1042_v16  ;;  %v1074_v50 = vld [vmem:[%s1396_s1 + $0x160] sm:$0xff]   ;;  %v1073_v51 = vld [vmem:[%s1396_s1 + $0x198] sm:$0xff]   ;;  %v1077_v53 = vld [vmem:[%s1396_s1 + $0x168] sm:$0xff]  }
  0x11   :  { %935 = vmatpush3.bf16.msra.mxu1 %v1041_v15  ;;  %v1075_v52 = vld [vmem:[%s1396_s1 + $0x120] sm:$0xff]   ;;  %v1078_v55 = vld [vmem:[%s1396_s1 + $0x128] sm:$0xff]   ;;  %v1080_v56 = vld [vmem:[%s1396_s1 + $0x170] sm:$0xff]  }
  0x12   :  { %936 = vmatprep.subr.bf16.mxu1 %v1044_v18  ;;  %v1076_v54 = vld [vmem:[%s1396_s1 + $0x1a0] sm:$0xff]   ;;  %v1079_v57 = vld [vmem:[%s1396_s1 + $0x1a8] sm:$0xff]   ;;  %v1081_v58 = vld [vmem:[%s1396_s1 + $0x130] sm:$0xff]  }
  0x13   :  { %915 = vmatpush3.bf16.msra.mxu0 %v1043_v17  ;;  %v30_v59 = vld [vmem:[%s1395_s0 + $0x10] sm:$0xff]  ;;  %v1083_v62 = vld [vmem:[%s1396_s1 + $0x178] sm:$0xff]  }
  0x14   :  { %916 = vmatprep.subr.bf16.mxu0 %v1046_v20  ;;  %v1082_v60 = vld [vmem:[%s1396_s1 + $0x1b0] sm:$0xff]   ;;  %v840_v61 = vcombine.high %v30_v59, %v30_v59  ;;  %v1084_v63 = vld [vmem:[%s1396_s1 + $0x138] sm:$0xff]  }
  0x15   :  { %937 = vmatpush3.bf16.msra.mxu1 %v1045_v19 }
  0x16   :  { %938 = vmatprep.subr.bf16.mxu1 %v1048_v22 }
  0x17   :  { %917 = vmatpush3.bf16.msra.mxu0 %v1047_v21 }
  0x18   :  { %918 = vmatprep.subr.bf16.mxu0 %v1050_v24 }
  0x19   :  { %939 = vmatpush3.bf16.msra.mxu1 %v1049_v23 }
  0x1a   :  { %940 = vmatprep.subr.bf16.mxu1 %v1052_v26 }
  0x1b   :  { %919 = vmatpush3.bf16.msra.mxu0 %v1051_v25 }
  0x1c   :  { %920 = vmatprep.subr.bf16.mxu0 %v1054_v28 }
  0x1d   :  { %941 = vmatpush3.bf16.msra.mxu1 %v1053_v27 }
  0x1e   :  { %942 = vmatprep.subr.bf16.mxu1 %v1056_v30 }
  0x1f   :  { %921 = vmatpush3.bf16.msra.mxu0 %v1055_v29 }
  0x20   :  { %950 = vmatprep.subr.bf16.mxu0 %v1060_v35 }
  0x21   :  { %943 = vmatpush3.bf16.msra.mxu1 %v1059_v34 }
  0x22   :  { %545 = vmatmul.mubr.bf16.vlgmr.msra.gmra.mrb[0].mxu0 %v835_v32  ;;  %987 = vmatprep.subr.bf16.mxu1 %v1121_v42 }
  0x23   :  { %951 = vmatpush3.bf16.msra.mxu0 %v1063_v39  ;;  %624 = vmatprep.mubr.bf16.mxu0 %v840_v61 }
  0x24   :  { %585 = vmatmul.mubr.bf16.vlgmr.msra.gmra.mrb[0].mxu1 %v837_v37  ;;  %952 = vmatprep.subr.bf16.mxu0 %v1065_v41 }
  0x25   :  { %988 = vmatpush3.bf16.msra.mxu1 %v1064_v40  ;;  %1003 = vmatprep.mubr.msk.bf16.mxu1 %vm1122_vm0, %v1121_v42 }
  0x26   :  { %989 = vmatprep.subr.bf16.mxu1 %v1121_v42 }
  0x27   :  { %953 = vmatpush3.bf16.msra.mxu0 %v1066_v43 }
  0x28   :  { %954 = vmatprep.subr.bf16.mxu0 %v1068_v45 }
  0x29   :  { %990 = vmatpush3.bf16.msra.mxu1 %v1067_v44 }
  0x2a   :  { %991 = vmatprep.subr.bf16.mxu1 %v1121_v42 }
  0x2b   :  { %955 = vmatpush3.bf16.msra.mxu0 %v1069_v46 }
  0x2c   :  { %956 = vmatprep.subr.bf16.mxu0 %v1071_v48 }
  0x2d   :  { %992 = vmatpush3.bf16.msra.mxu1 %v1070_v47 }
  0x2e   :  { %993 = vmatprep.subr.bf16.mxu1 %v1121_v42 }
  0x2f   :  { %957 = vmatpush3.bf16.msra.mxu0 %v1072_v49 }
  0x30   :  { %958 = vmatprep.subr.bf16.mxu0 %v1074_v50 }
  0x31   :  { %994 = vmatpush3.bf16.msra.mxu1 %v1073_v51 }
  0x32   :  { %995 = vmatprep.subr.bf16.mxu1 %v1121_v42 }
  0x33   :  { %959 = vmatpush3.bf16.msra.mxu0 %v1075_v52 }
  0x34   :  { %960 = vmatprep.subr.bf16.mxu0 %v1077_v53 }
  0x35   :  { %996 = vmatpush3.bf16.msra.mxu1 %v1076_v54 }
  0x36   :  { %997 = vmatprep.subr.bf16.mxu1 %v1121_v42 }
  0x37   :  { %961 = vmatpush3.bf16.msra.mxu0 %v1078_v55 }
  0x38   :  { %962 = vmatprep.subr.bf16.mxu0 %v1080_v56 }
  0x39   :  { %998 = vmatpush3.bf16.msra.mxu1 %v1079_v57 }
  0x3a   :  { %999 = vmatprep.subr.bf16.mxu1 %v1121_v42 }
  0x3b   :  { %963 = vmatpush3.bf16.msra.mxu0 %v1081_v58 }
  0x3c   :  { %12 = vsyncpa [#allocation3], 0  ;;  %964 = vmatprep.subr.bf16.mxu0 %v1083_v62  ;;  %v1087_v0 = vld [vmem:[%s1396_s1 + $0x1b8] sm:$0xff]   ;;  %v839_v1 = vcombine.low %v30_v59, %v30_v59  ;;  %v1089_v3 = vld [vmem:[%s1398_s3] sm:$0xff]   ;;  %vm697_vm1 = vcmask 261120  }
  0x3d   :  { %1000 = vmatpush3.bf16.msra.mxu1 %v1082_v60  ;;  %v1088_v2 = vld [vmem:[%s1395_s0 + $0x18] ss:$0 sps:$4 sm:$0xff]   ;;  %v1090_v4 = vld [vmem:[%s1398_s3 + $0x8] sm:$0xff]   ;;  %v1091_v5 = vld [vmem:[%s1400_s5] sm:$0xff]  }
  0x3e   :  { %1001 = vmatprep.subr.bf16.mxu1 %v1121_v42  ;;  %v834_v7 = vld [vmem:[%s1397_s2] ss:$0 sm:$0xff]  ;;  %v1092_v32 = vld [vmem:[%s1400_s5 + $0x8] sm:$0xff]  }
  0x3f   :  { %965 = vmatpush3.bf16.msra.mxu0 %v1084_v63  ;;  %v898_v33 = vld [vmem:[%s1399_s4] ss:$0 sm:$0xff]  ;;  %s1123_s4 = smov [#allocation2]  }
  0x40   :  { %1007 = vmatprep.subr.bf16.mxu0 %v1121_v42  ;;  %v902_v41 = vld [vmem:[%s1401_s6] ss:$0 sm:$0xff]  ;;  %s826_s5 = sshll.u32 %s1123_s4, 4  ;;  %s827_s5 = int_to_ptr.vmem [resolvable:$true] %s826_s5 }
  0x41   :  { %1002 = vmatpush3.bf16.msra.mxu1 %v1087_v0  ;;  %s1097_s6 = scalar_lea.vmem %s827_s5, 128  ;;  %p1102_p1 = scmp.lt.s32.totalorder %s827_s5, %s827_s5 }
  0x42   :  { %625 = vmatmul.mubr.bf16.vlgmr.msra.gmra.mrb[4].mxu0 %v839_v1  ;;  %1015 = vmatprep.subr.bf16.mxu1 %v1121_v42  ;;  %p1098_p0 = scmp.ne.s32.totalorder %s827_s5, %s1097_s6  ;;  %p1103_p2 = scmp.lt.s32.totalorder %s1097_s6, %s1097_s6 }
  0x43   :  { %1011 = vmatprep.mubr.msk.bf16.mxu0 %vm1122_vm0, %v1121_v42  ;;  %1008 = vmatpush3.bf16.msra.mxu0 %v1089_v3 }
  0x44   :  { %1004 = vmatmul.mubr.bf16.vlgmr.msra.gmra.mrb[4].mxu1 %v1088_v2  ;;  %1009 = vmatprep.subr.bf16.mxu0 %v1121_v42  ;;  %p1104_p3 = por %p1103_p2, %p1102_p1 }
  0x45   :  { %1019 = vmatprep.mubr.msk.bf16.mxu1 %vm1122_vm0, %v1121_v42  ;;  %1016 = vmatpush3.bf16.msra.mxu1 %v1091_v5 }
  0x46   :  { %1017 = vmatprep.subr.bf16.mxu1 %v1121_v42  ;;  %p1105_p4 = pnand %p1104_p3, %p1098_p0 }
  0x47   :  { %1010 = vmatpush3.bf16.msra.mxu0 %v1090_v4 }
  0x49   :  { %1018 = vmatpush3.bf16.msra.mxu1 %v1092_v32 }
  0xf5   :  { %v922_v6 = vpop.f32.mrb[0].mxu0 }
  0xf6   :  { %v923_v8 = vpop.f32.mrb[1].mxu0 }
  0xf7   :  { %v924_v9 = vadd.f32 %v923_v8, %v922_v6  ;;  %v925_v10 = vpop.f32.mrb[2].mxu0  ;;  %v944_v11 = vpop.f32.mrb[0].mxu1 }
  0xf8   :  { %v926_v12 = vpop.f32.mrb[3].mxu0  ;;  %v945_v13 = vpop.f32.mrb[1].mxu1 }
  0xf9   :  { %v547_v14 = vadd.f32 %v924_v9, %v834_v7  ;;  %v946_v15 = vadd.f32 %v945_v13, %v944_v11  ;;  %v947_v16 = vpop.f32.mrb[2].mxu1 }
  0xfa   :  { %v948_v17 = vpop.f32.mrb[3].mxu1 }
  0xfb   :  { %v587_v18 = vadd.f32 %v946_v15, %v547_v14 }
 0x115   :  { %v966_v19 = vpop.f32.mrb[4].mxu0 }
 0x116   :  { %v967_v20 = vpop.f32.mrb[5].mxu0 }
 0x117   :  { %v968_v21 = vadd.f32 %v967_v20, %v966_v19  ;;  %v969_v22 = vpop.f32.mrb[6].mxu0  ;;  %v666_v23 = vpop.f32.mrb[4].mxu1 }
 0x118   :  { %v970_v24 = vpop.f32.mrb[7].mxu0  ;;  %v1005_v25 = vpop.f32.mrb[5].mxu1 }
 0x119   :  { %v627_v26 = vadd.f32 %v968_v21, %v587_v18  ;;  %v669_v27 = vpop.f32.mrb[6].mxu1 }
 0x11a   :  { %v1006_v28 = vpop.f32.mrb[7].mxu1 }
 0x11b   :  { %v667_v29 = vadd.f32 %v666_v23, %v627_v26 }
 0x11d   :  { %v672_v30 = vmax.f32 %v667_v29, 0.0 }
 0x11f   :  { %v673_v31 = vpack.c.bf16 %v672_v30, %v672_v30 }
 0x121   :  { %1012 = vmatmul.mubr.msk.bf16.vlgmr.msra.gmra.mrb[8].mxu0 %vm697_vm1, %v673_v31 }
 0x1f4   :  { %v735_v34 = vpop.f32.mrb[8].mxu0 }
 0x1f5   :  { %v736_v35 = vadd.f32 %v898_v33, %v735_v34  ;;  %v1013_v36 = vpop.f32.mrb[9].mxu0 }
 0x1f6   :  { %v738_v37 = vpop.f32.mrb[10].mxu0 }
 0x1f7   :  { %v741_v38 = vmax.f32 %v736_v35, 0.0  ;;  %v1014_v39 = vpop.f32.mrb[11].mxu0 }
 0x1f9   :  { %v742_v40 = vpack.c.bf16 %v741_v38, %v741_v38 }
 0x1fb   :  { %1020 = vmatmul.mubr.msk.bf16.vlgmr.msra.gmra.mrb[8].mxu1 %vm697_vm1, %v742_v40 }
 0x2ce   :  { %v803_v42 = vpop.f32.mrb[8].mxu1 }
 0x2cf   :  { %v804_v43 = vadd.f32 %v902_v41, %v803_v42  ;;  %v1021_v44 = vpop.f32.mrb[9].mxu1 }
 0x2d0   :  { %v806_v45 = vpop.f32.mrb[10].mxu1 }
 0x2d1   :  { %809 = vmax.xlane.f32.xlu0 %v804_v43  ;;  %v1022_v46 = vpop.f32.mrb[11].mxu1 }
 0x35e   :  { %v810_v47 = vpop.xlane.xlu0 %809 }
 0x35f   :  { %v811_v48 = vsub.f32 %v804_v43, %v810_v47 }
 0x361   :  { %v812_v49 = vmul.f32 1.442695, %v811_v48 }
 0x363   :  { %1093 = vpow2.f32 %v812_v49 }
 0x36d   :  { %v1094_v50 = vpop.eup %1093 }
 0x36e   :  { %814 = vadd.xlane.f32.xlu0 %v1094_v50 }
 0x3fb   :  { %v815_v51 = vpop.xlane.xlu0 %814 }
 0x3fc   :  { %1095 = vlog2.f32 %v815_v51 }
 0x406   :  { %v1096_v52 = vpop.eup %1095 }
 0x407   :  { %v817_v53 = vmul.f32 0.6931472, %v1096_v52 }
 0x409   :  { %v818_v54 = vsub.f32 %v811_v48, %v817_v53 }
 0x40b   :  { %819 = vst [vmem:[#allocation2] sm:$0xff] %v818_v54 }
 0x40c   :  { %1108 = shalt.err (!%p1105_p4)
}
 0x40d   :  { %s1109_s18 = scalar_lea.hbm %s1402_s7, 128 }
 0x40e   :  { %p1110_p5 = scmp.ne.s32.totalorder %s1402_s7, %s1109_s18  ;;  %p1113_p6 = scmp.lt.u32.totalorder %s1109_s18, %s1402_s7 }
 0x410   :  { %p1115_p7 = pnand %p1113_p6, %p1110_p5 }
 0x412   :  { %1118 = shalt.err (!%p1115_p7)
}
 0x413   :  { %829 = dma.vmem_to_hbm [thread:$0]  %s827_s5, 128, %s1402_s7, [#allocation3]  }
 0x414   :  { %1119 = dma.done.wait [#allocation3], 128  }
 0x415   :  { %1120 = vsyncadd [#allocation3], 4294967168 }
 0x416   :  { %833 = vsyncpa [#allocation3], 1 }

</bundles_post_ra>
